<compile_context>
chip_gen: v7x
topology: tpu7x:2x2x1
jax: 0.10.0
libtpu: 0.0.40
codegen_flags: <defaults>
</compile_context>

<pallas_src>
import jax
import jax.numpy as jnp
from jax.experimental import pallas as pl
from jax.experimental.pallas import tpu as pltpu


# ---------------------------------------------------------------------------
# Kernel: whole MLP hot path, batch on the lane axis.
#   x_ref : (3,  TN)   w*_ref : [out, in]   b*_ref : [out, 1]   out : (8, TN)
# ---------------------------------------------------------------------------
def _pinn_kernel(x_ref, w1_ref, b1_ref, w2_ref, b2_ref, w3_ref, b3_ref,
                 wh_ref, bh_ref, out_ref):
    x = x_ref[...]                                                  # (3, TN)

    h = jnp.tanh(jnp.dot(w1_ref[...], x,
                         preferred_element_type=jnp.float32) + b1_ref[...])
    h = jnp.tanh(jnp.dot(w2_ref[...], h,
                         preferred_element_type=jnp.float32) + b2_ref[...])
    h = jnp.tanh(jnp.dot(w3_ref[...], h,
                         preferred_element_type=jnp.float32) + b3_ref[...])

    out_ref[...] = (jnp.dot(wh_ref[...], h,
                            preferred_element_type=jnp.float32)
                    + bh_ref[...])                                  # (8, TN)


# ---------------------------------------------------------------------------
# Wrapper
# ---------------------------------------------------------------------------
def pinn_forward(x, params, *, tn=1024):
    """x: (N, 3) float32.  Returns (u, v, p, k, omega), each (N, 1)."""
    (w1, b1, w2, b2, w3, b3, wh, bh) = params
    n, d_in = x.shape
    assert d_in == 3
    assert tn % 128 == 0

    # Fused head padded from 5 -> 8 output rows: sublane-aligned output tile,
    # extra rows are zeros and get sliced off below.
    wh8 = jnp.pad(wh, ((0, 8 - wh.shape[0]), (0, 0)))               # (8, 20)
    bh8 = jnp.pad(bh, ((0, 8 - bh.shape[0]), (0, 0)))               # (8, 1)

    # Lane tile: multiple of 128, at most `tn`, and at most ~half the batch
    # so that large batches produce >=2 parallel grid steps (2 TCs on v7x).
    half = pl.cdiv(pl.cdiv(n, 2), 128) * 128
    tile = max(128, min(tn, half))
    n_pad = pl.cdiv(n, tile) * tile

    # Batch-on-lanes layout: (3, N) with zero-padded columns.
    xt = jnp.pad(x.T, ((0, 0), (0, n_pad - n)))                     # (3, n_pad)

    grid = (n_pad // tile,)
    const = lambda a: pl.BlockSpec(a.shape, lambda i: (0, 0))       # whole array

    out = pl.pallas_call(
        _pinn_kernel,
        out_shape=jax.ShapeDtypeStruct((8, n_pad), jnp.float32),
        grid_spec=pltpu.PrefetchScalarGridSpec(
            num_scalar_prefetch=0,
            grid=grid,
            in_specs=[
                pl.BlockSpec((3, tile), lambda i: (0, i)),          # x tile
                const(w1), const(b1),
                const(w2), const(b2),
                const(w3), const(b3),
                const(wh8), const(bh8),
            ],
            out_specs=pl.BlockSpec((8, tile), lambda i: (0, i)),
        ),
        compiler_params=pltpu.CompilerParams(
            dimension_semantics=("parallel",)),
    )(xt, w1, b1, w2, b2, w3, b3, wh8, bh8)

    # Drop head padding rows + batch padding columns, then split the 5 heads.
    out = out[:5, :n]                                               # (5, N)
    u, v, p, k, omega = [row.T for row in jnp.split(out, 5, axis=0)]
    return u, v, p, k, omega


# ---------------------------------------------------------------------------
# Deterministic parameter init (mirrors nn.Linear, PyTorch [out, in] layout)
# ---------------------------------------------------------------------------
def init_params(key):
    def linear(key, fan_in, fan_out):
        kw, kb = jax.random.split(key)
        bound = 1.0 / jnp.sqrt(fan_in)
        w = jax.random.uniform(kw, (fan_out, fan_in), jnp.float32,
                               minval=-bound, maxval=bound)
        b = jax.random.uniform(kb, (fan_out, 1), jnp.float32,
                               minval=-bound, maxval=bound)
        return w, b

    keys = jax.random.split(key, 8)
    w1, b1 = linear(keys[0], 3, 20)
    w2, b2 = linear(keys[1], 20, 20)
    w3, b3 = linear(keys[2], 20, 20)
    # five scalar heads fused into one (5, 20) weight / (5, 1) bias
    head_ws, head_bs = [], []
    for i in range(5):
        w, b = linear(keys[3 + i], 20, 1)
        head_ws.append(w)
        head_bs.append(b)
    wh = jnp.concatenate(head_ws, axis=0)   # (5, 20)
    bh = jnp.concatenate(head_bs, axis=0)   # (5, 1)
    return (w1, b1, w2, b2, w3, b3, wh, bh)


# ---------------------------------------------------------------------------
# Reference (pure JAX) for sanity checking
# ---------------------------------------------------------------------------
def pinn_ref(x, params):
    (w1, b1, w2, b2, w3, b3, wh, bh) = params
    h = jnp.tanh(x @ w1.T + b1.T)
    h = jnp.tanh(h @ w2.T + b2.T)
    h = jnp.tanh(h @ w3.T + b3.T)
    out = h @ wh.T + bh.T
    return jnp.split(out, 5, axis=1)


if __name__ == "__main__":
    key = jax.random.PRNGKey(0)
    kx, kp = jax.random.split(key)

    # small batch of (x, y, t)-style collocation points
    x = jax.random.normal(kx, (8, 3), dtype=jnp.float32)
    params = init_params(kp)

    outs = pinn_forward(x, params)
    outs = jax.block_until_ready(outs)

    refs = pinn_ref(x, params)
    for o, r in zip(outs, refs):
        assert o.shape == (8, 1)
        assert jnp.allclose(o, r, atol=1e-5, rtol=1e-5)

    print("KERNEL_OK")
</pallas_src>

<mosaic_0001>
module attributes {stable_mosaic.version = 11 : i64} {
  func.func @_pinn_kernel(%arg0: i32, %arg1: memref<3x128xf32, #tpu.memory_space<vmem>>, %arg2: memref<20x3xf32, #tpu.memory_space<vmem>>, %arg3: memref<20x1xf32, #tpu.memory_space<vmem>>, %arg4: memref<20x20xf32, #tpu.memory_space<vmem>>, %arg5: memref<20x1xf32, #tpu.memory_space<vmem>>, %arg6: memref<20x20xf32, #tpu.memory_space<vmem>>, %arg7: memref<20x1xf32, #tpu.memory_space<vmem>>, %arg8: memref<8x20xf32, #tpu.memory_space<vmem>>, %arg9: memref<8x1xf32, #tpu.memory_space<vmem>>, %arg10: memref<8x128xf32, #tpu.memory_space<vmem>>) attributes {dimension_semantics = [#tpu.dimension_semantics<parallel>], iteration_bounds = array<i64: 1>, scalar_prefetch = 0 : i64, scratch_operands = 0 : i64, tpu.core_type = #tpu.core_type<tc>, window_params = [{transform_indices = @transform_0, window_bounds = array<i64: 3, 128>}, {pipeline_mode = #tpu.pipeline_mode<synchronous>, transform_indices = @transform_1, window_bounds = array<i64: 20, 3>}, {pipeline_mode = #tpu.pipeline_mode<synchronous>, transform_indices = @transform_2, window_bounds = array<i64: 20, 1>}, {pipeline_mode = #tpu.pipeline_mode<synchronous>, transform_indices = @transform_3, window_bounds = array<i64: 20, 20>}, {pipeline_mode = #tpu.pipeline_mode<synchronous>, transform_indices = @transform_4, window_bounds = array<i64: 20, 1>}, {pipeline_mode = #tpu.pipeline_mode<synchronous>, transform_indices = @transform_5, window_bounds = array<i64: 20, 20>}, {pipeline_mode = #tpu.pipeline_mode<synchronous>, transform_indices = @transform_6, window_bounds = array<i64: 20, 1>}, {pipeline_mode = #tpu.pipeline_mode<synchronous>, transform_indices = @transform_7, window_bounds = array<i64: 8, 20>}, {pipeline_mode = #tpu.pipeline_mode<synchronous>, transform_indices = @transform_8, window_bounds = array<i64: 8, 1>}, {transform_indices = @transform_9, window_bounds = array<i64: 8, 128>}]} {
    %c0 = arith.constant 0 : index
    %c0_0 = arith.constant 0 : index
    %0 = vector.load %arg1[%c0, %c0_0] : memref<3x128xf32, #tpu.memory_space<vmem>>, vector<3x128xf32>
    %c0_1 = arith.constant 0 : index
    %c0_2 = arith.constant 0 : index
    %1 = vector.load %arg2[%c0_1, %c0_2] : memref<20x3xf32, #tpu.memory_space<vmem>>, vector<20x3xf32>
    %cst = arith.constant dense<0.000000e+00> : vector<20x128xf32>
    %2 = tpu.matmul %1, %0, %cst {dimension_numbers = #tpu.dot_dimension_numbers<[1], [0], [0], [1], [0, 0, 1, 1], [], []>} : vector<20x3xf32>, vector<3x128xf32>, vector<20x128xf32> -> vector<20x128xf32>
    %c0_3 = arith.constant 0 : index
    %c0_4 = arith.constant 0 : index
    %3 = vector.load %arg3[%c0_3, %c0_4] : memref<20x1xf32, #tpu.memory_space<vmem>>, vector<20x1xf32>
    %4 = vector.broadcast %3 : vector<20x1xf32> to vector<20x128xf32>
    %5 = arith.addf %2, %4 : vector<20x128xf32>
    %6 = math.tanh %5 : vector<20x128xf32>
    %c0_5 = arith.constant 0 : index
    %c0_6 = arith.constant 0 : index
    %7 = vector.load %arg4[%c0_5, %c0_6] : memref<20x20xf32, #tpu.memory_space<vmem>>, vector<20x20xf32>
    %cst_7 = arith.constant dense<0.000000e+00> : vector<20x128xf32>
    %8 = tpu.matmul %7, %6, %cst_7 {dimension_numbers = #tpu.dot_dimension_numbers<[1], [0], [0], [1], [0, 0, 1, 1], [], []>} : vector<20x20xf32>, vector<20x128xf32>, vector<20x128xf32> -> vector<20x128xf32>
    %c0_8 = arith.constant 0 : index
    %c0_9 = arith.constant 0 : index
    %9 = vector.load %arg5[%c0_8, %c0_9] : memref<20x1xf32, #tpu.memory_space<vmem>>, vector<20x1xf32>
    %10 = vector.broadcast %9 : vector<20x1xf32> to vector<20x128xf32>
    %11 = arith.addf %8, %10 : vector<20x128xf32>
    %12 = math.tanh %11 : vector<20x128xf32>
    %c0_10 = arith.constant 0 : index
    %c0_11 = arith.constant 0 : index
    %13 = vector.load %arg6[%c0_10, %c0_11] : memref<20x20xf32, #tpu.memory_space<vmem>>, vector<20x20xf32>
    %cst_12 = arith.constant dense<0.000000e+00> : vector<20x128xf32>
    %14 = tpu.matmul %13, %12, %cst_12 {dimension_numbers = #tpu.dot_dimension_numbers<[1], [0], [0], [1], [0, 0, 1, 1], [], []>} : vector<20x20xf32>, vector<20x128xf32>, vector<20x128xf32> -> vector<20x128xf32>
    %c0_13 = arith.constant 0 : index
    %c0_14 = arith.constant 0 : index
    %15 = vector.load %arg7[%c0_13, %c0_14] : memref<20x1xf32, #tpu.memory_space<vmem>>, vector<20x1xf32>
    %16 = vector.broadcast %15 : vector<20x1xf32> to vector<20x128xf32>
    %17 = arith.addf %14, %16 : vector<20x128xf32>
    %18 = math.tanh %17 : vector<20x128xf32>
    %c0_15 = arith.constant 0 : index
    %c0_16 = arith.constant 0 : index
    %19 = vector.load %arg8[%c0_15, %c0_16] : memref<8x20xf32, #tpu.memory_space<vmem>>, vector<8x20xf32>
    %cst_17 = arith.constant dense<0.000000e+00> : vector<8x128xf32>
    %20 = tpu.matmul %19, %18, %cst_17 {dimension_numbers = #tpu.dot_dimension_numbers<[1], [0], [0], [1], [0, 0, 1, 1], [], []>} : vector<8x20xf32>, vector<20x128xf32>, vector<8x128xf32> -> vector<8x128xf32>
    %c0_18 = arith.constant 0 : index
    %c0_19 = arith.constant 0 : index
    %21 = vector.load %arg9[%c0_18, %c0_19] : memref<8x1xf32, #tpu.memory_space<vmem>>, vector<8x1xf32>
    %22 = vector.broadcast %21 : vector<8x1xf32> to vector<8x128xf32>
    %23 = arith.addf %20, %22 : vector<8x128xf32>
    %c0_20 = arith.constant 0 : index
    %c0_21 = arith.constant 0 : index
    %24 = vector.load %arg10[%c0_20, %c0_21] : memref<8x128xf32, #tpu.memory_space<vmem>>, vector<8x128xf32>
    tpu.vector_store %arg10[%c0_20, %c0_21], %23 {strides = array<i32>} : memref<8x128xf32, #tpu.memory_space<vmem>>, vector<8x128xf32>,
    return
  }
  func.func @transform_0(%arg0: i32) -> (i32, i32) {
    %c0_i32 = arith.constant 0 : i32
    %c0_i32_0 = arith.constant 0 : i32
    return %c0_i32, %arg0 : i32, i32
  }
  func.func @transform_1(%arg0: i32) -> (i32, i32) {
    %c0_i32 = arith.constant 0 : i32
    %c0_i32_0 = arith.constant 0 : i32
    %c0_i32_1 = arith.constant 0 : i32
    return %c0_i32, %c0_i32_0 : i32, i32
  }
  func.func @transform_2(%arg0: i32) -> (i32, i32) {
    %c0_i32 = arith.constant 0 : i32
    %c0_i32_0 = arith.constant 0 : i32
    %c0_i32_1 = arith.constant 0 : i32
    return %c0_i32, %c0_i32_0 : i32, i32
  }
  func.func @transform_3(%arg0: i32) -> (i32, i32) {
    %c0_i32 = arith.constant 0 : i32
    %c0_i32_0 = arith.constant 0 : i32
    %c0_i32_1 = arith.constant 0 : i32
    return %c0_i32, %c0_i32_0 : i32, i32
  }
  func.func @transform_4(%arg0: i32) -> (i32, i32) {
    %c0_i32 = arith.constant 0 : i32
    %c0_i32_0 = arith.constant 0 : i32
    %c0_i32_1 = arith.constant 0 : i32
    return %c0_i32, %c0_i32_0 : i32, i32
  }
  func.func @transform_5(%arg0: i32) -> (i32, i32) {
    %c0_i32 = arith.constant 0 : i32
    %c0_i32_0 = arith.constant 0 : i32
    %c0_i32_1 = arith.constant 0 : i32
    return %c0_i32, %c0_i32_0 : i32, i32
  }
  func.func @transform_6(%arg0: i32) -> (i32, i32) {
    %c0_i32 = arith.constant 0 : i32
    %c0_i32_0 = arith.constant 0 : i32
    %c0_i32_1 = arith.constant 0 : i32
    return %c0_i32, %c0_i32_0 : i32, i32
  }
  func.func @transform_7(%arg0: i32) -> (i32, i32) {
    %c0_i32 = arith.constant 0 : i32
    %c0_i32_0 = arith.constant 0 : i32
    %c0_i32_1 = arith.constant 0 : i32
    return %c0_i32, %c0_i32_0 : i32, i32
  }
  func.func @transform_8(%arg0: i32) -> (i32, i32) {
    %c0_i32 = arith.constant 0 : i32
    %c0_i32_0 = arith.constant 0 : i32
    %c0_i32_1 = arith.constant 0 : i32
    return %c0_i32, %c0_i32_0 : i32, i32
  }
  func.func @transform_9(%arg0: i32) -> (i32, i32) {
    %c0_i32 = arith.constant 0 : i32
    %c0_i32_0 = arith.constant 0 : i32
    return %c0_i32, %arg0 : i32, i32
  }
}

</mosaic_0001>

<bundles_post_ra>
// kernel: tpu_custom_call.1
= control target key start
LH: loop header
LB: loop body
LE: loop exit
PB: predicated region body
PF: predicated region fallthrough
CT: control target
= control target key end

     0   :  { %vm65_vm0 = vcmask 1042432   ;;  %v628_v2 = vmov 0.0   ;;  %vm629_vm1 = vmmov 0   ;;  %vm55_vm2 = vcmask 23552   ;;  %s796_s0 = inlined_call_operand.vmem [shape: f32[3,128], index: 0, kind: input, shape index: {}]   ;;  %s797_s1 = inlined_call_operand.vmem [shape: f32[20,3], index: 1, kind: input, shape index: {}]   ;;  %s798_s2 = inlined_call_operand.vmem [shape: f32[20,1], index: 2, kind: input, shape index: {}]   ;;  %s799_s3 = inlined_call_operand.vmem [shape: f32[20,20], index: 3, kind: input, shape index: {}]   ;;  %s800_s4 = inlined_call_operand.vmem [shape: f32[20,1], index: 4, kind: input, shape index: {}]   ;;  %s801_s5 = inlined_call_operand.vmem [shape: f32[20,20], index: 5, kind: input, shape index: {}]   ;;  %s802_s6 = inlined_call_operand.vmem [shape: f32[20,1], index: 6, kind: input, shape index: {}]   ;;  %s803_s7 = inlined_call_operand.vmem [shape: f32[8,20], index: 7, kind: input, shape index: {}]   ;;  %s804_s8 = inlined_call_operand.vmem [shape: f32[8,1], index: 8, kind: input, shape index: {}]   ;;  %s805_s9 = inlined_call_operand.hbm [shape: f32[8,128], index: 9, kind: output, shape index: {}]  }
   0x1   :  { %v33_v0 = vld [vmem:[%s796_s0] sm:$0x7]  ;;  %518 = vmatprep.subr.mxu0 %v628_v2  ;;  %520 = vmatprep.mubr.msk.f32.mxu0 %vm629_vm1, %v628_v2  ;;  %v36_v3 = vld [vmem:[%s797_s1 + $0x10] sm:$0xf]  ;;  %v35_v5 = vld [vmem:[%s797_s1 + $0x8] sm:$0xff]  ;;  %v630_v7 = vmov 0  }
   0x2   :  { %v34_v1 = vld [vmem:[%s797_s1] sm:$0xff]  ;;  %519 = vmatpush3.msk.msra.mxu0 %vm65_vm0, %v33_v0  ;;  %577 = vmatprep.subr.mxu1 %v628_v2  ;;  %v39_v6 = vld [vmem:[%s798_s2 + $0x10] sm:$0xf] }
   0x3   :  { %521 = vmatmul.mubr.msk.f32.vlgmr.msra.gmra.mrb[0].mxu0 %vm55_vm2, %v34_v1  ;;  %578 = vmatpush3.msk.msra.mxu1 %vm65_vm0, %v33_v0  ;;  %v37_v4 = vld [vmem:[%s798_s2] sm:$0xff] }
   0x4   :  { %523 = vmatprep.mubr.msk.f32.mxu0 %vm629_vm1, %v628_v2  ;;  %526 = vmatprep.mubr.msk.f32.mxu1 %vm629_vm1, %v628_v2 }
   0x5   :  { %527 = vmatmul.mubr.msk.f32.vlgmr.msra.gmra.mrb[0].mxu1 %vm55_vm2, %v36_v3  ;;  %584 = vset.pattern.permute.xlu0 %v630_v7 }
   0x6   :  { %14 = vsyncpa [#allocation3], 0  ;;  %42 = vperm.xlu0 %584, %v37_v4   ;;  %585 = vset.pattern.permute.xlu1 %v630_v7  ;;  %v38_v8 = vld [vmem:[%s798_s2 + $0x8] sm:$0xff]  ;;  %v155_v9 = vld [vmem:[%s800_s4] sm:$0xff]  ;;  %v631_v16 = vmov 0.0|0.0   ;;  %vm183_vm3 = vcmask 1043456  }
   0x7   :  { %524 = vmatmul.mubr.msk.f32.gmra.mrb[2].mxu0 %vm55_vm2, %v35_v5  ;;  %52 = vperm.xlu1 %585, %v39_v6   ;;  %v156_v10 = vld [vmem:[%s800_s4 + $0x8] sm:$0xff]  ;;  %v157_v11 = vld [vmem:[%s800_s4 + $0x10] sm:$0xf]  ;;  %v273_v12 = vld [vmem:[%s802_s6] sm:$0xff]  ;;  %vm173_vm4 = vcmask 162816   ;;  %s632_s21 = smov [#allocation2]  }
   0x8   :  { %535 = vmatprep.mubr.msk.f32.mxu1 %vm629_vm1, %v628_v2  ;;  %550 = vmatprep.mubr.msk.f32.mxu0 %vm629_vm1, %v628_v2  ;;  %v274_v13 = vld [vmem:[%s802_s6 + $0x8] sm:$0xff]  ;;  %v275_v14 = vld [vmem:[%s802_s6 + $0x10] sm:$0xf]  ;;  %v387_v15 = vld [vmem:[%s804_s8] sm:$0xff]  ;;  %s476_s1 = sshll.u32 %s632_s21, 4  ;;  %s477_s1 = int_to_ptr.vmem [resolvable:$true] %s476_s1 }
   0x9   :  { %568 = vmatprep.subr.bf16.mxu1 %v631_v16  ;;  %571 = vmatprep.subr.bf16.mxu0 %v631_v16  ;;  %v152_v33 = vld [vmem:[%s799_s3] sm:$0xff]  ;;  %v153_v34 = vld [vmem:[%s799_s3 + $0x8] sm:$0xff]  ;;  %v154_v35 = vld [vmem:[%s799_s3 + $0x10] sm:$0xf]  ;;  %s604_s22 = scalar_lea.vmem %s477_s1, 128  ;;  %p609_p1 = scmp.lt.s32.totalorder %s477_s1, %s477_s1 }
   0xa   :  { %47 = vperm.xlu0 %584, %v38_v8   ;;  %v270_v51 = vld [vmem:[%s801_s5] sm:$0xff]  ;;  %v271_v53 = vld [vmem:[%s801_s5 + $0x8] sm:$0xff]  ;;  %v272_v54 = vld [vmem:[%s801_s5 + $0x10] sm:$0xf]  ;;  %p605_p0 = scmp.ne.s32.totalorder %s477_s1, %s604_s22  ;;  %p610_p2 = scmp.lt.s32.totalorder %s604_s22, %s604_s22 }
   0xb   :  { %160 = vperm.xlu1 %585, %v155_v9   ;;  %v386_v7 = vld [vmem:[%s803_s7] sm:$0xff] }
   0xc   :  { %p611_p3 = por %p610_p2, %p609_p1 }
   0xe   :  { %165 = vperm.xlu0 %584, %v156_v10   ;;  %p612_p4 = pnand %p611_p3, %p605_p0 }
   0xf   :  { %170 = vperm.xlu1 %585, %v157_v11  }
  0x12   :  { %278 = vperm.xlu0 %584, %v273_v12  }
  0x13   :  { %283 = vperm.xlu1 %585, %v274_v13  }
  0x16   :  { %288 = vperm.xlu0 %584, %v275_v14  }
  0x17   :  { %390 = vperm.xlu1 %585, %v387_v15  }
  0x85   :  { %v43_v17 = vpop.permute.xlu0 %42 }
  0x86   :  { %v53_v27 = vpop.permute.xlu1 %52 }
  0x89   :  { %v48_v23 = vpop.permute.xlu0 %47 }
  0x8a   :  { %v161_v37 = vpop.permute.xlu1 %160 }
  0x8d   :  { %v166_v40 = vpop.permute.xlu0 %165 }
  0x8e   :  { %v171_v44 = vpop.permute.xlu1 %170 }
  0x91   :  { %v279_v56 = vpop.permute.xlu0 %278 }
  0x92   :  { %v284_v59 = vpop.permute.xlu1 %283 }
  0x95   :  { %v289_v63 = vpop.permute.xlu0 %288 }
  0x96   :  { %v391_v9 = vpop.permute.xlu1 %390 }
  0xd6   :  { %v135_v18 = vpop.f32.mrb[0].mxu0 }
  0xd7   :  { %v522_v19 = vpop.f32.mrb[1].mxu0  ;;  %v136_v20 = vadd.f32 %v135_v18, %v43_v17 }
  0xd8   :  { %v145_v21 = vpop.f32.mrb[0].mxu1 }
  0xd9   :  { %v528_v22 = vpop.f32.mrb[1].mxu1  ;;  %586 = vtanh.f32 %v136_v20  ;;  %v146_v28 = vadd.f32 %v145_v21, %v53_v27 }
  0xda   :  { %v140_v24 = vpop.f32.mrb[2].mxu0 }
  0xdb   :  { %v141_v25 = vadd.f32 %v140_v24, %v48_v23  ;;  %v525_v26 = vpop.f32.mrb[3].mxu0 }
  0xdd   :  { %588 = vtanh.f32 %v141_v25 }
  0xde   :  { %590 = vtanh.f32 %v146_v28 }
  0xe3   :  { %v587_v29 = vpop.eup %586 }
  0xe7   :  { %v589_v30 = vpop.eup %588 }
  0xe8   :  { %v569_v31 = vpack.c.bf16 %v589_v30, %v587_v29  ;;  %v591_v32 = vpop.eup %590 }
  0xea   :  { %570 = vmatpush3.bf16.msra.mxu1 %v569_v31 }
  0xeb   :  { %533 = vmatprep.subr.mxu1 %v628_v2 }
  0xee   :  { %534 = vmatpush3.msk.msra.mxu1 %vm183_vm3, %v591_v32 }
  0xef   :  { %536 = vmatmul.mubr.msk.f32.vlgmr.msra.gmra.mrb[2].mxu1 %vm173_vm4, %v152_v33  ;;  %574 = vmatprep.subr.bf16.mxu1 %v631_v16 }
  0xf0   :  { %538 = vmatprep.mubr.msk.f32.mxu1 %vm629_vm1, %v628_v2 }
  0xf3   :  { %539 = vmatmul.mubr.msk.f32.gmra.mrb[4].mxu1 %vm173_vm4, %v153_v34 }
  0xf4   :  { %541 = vmatprep.mubr.msk.f32.mxu1 %vm629_vm1, %v628_v2 }
  0xf7   :  { %542 = vmatmul.mubr.msk.f32.gmra.mrb[6].mxu1 %vm173_vm4, %v154_v35 }
  0xf8   :  { %565 = vmatprep.mubr.msk.f32.mxu1 %vm629_vm1, %v628_v2 }
 0x1c2   :  { %v253_v36 = vpop.f32.mrb[2].mxu1 }
 0x1c3   :  { %v537_v38 = vpop.f32.mrb[3].mxu1  ;;  %v254_v39 = vadd.f32 %v253_v36, %v161_v37 }
 0x1c5   :  { %592 = vtanh.f32 %v254_v39 }
 0x1c6   :  { %v258_v41 = vpop.f32.mrb[4].mxu1 }
 0x1c7   :  { %v259_v42 = vadd.f32 %v258_v41, %v166_v40  ;;  %v540_v43 = vpop.f32.mrb[5].mxu1 }
 0x1c9   :  { %594 = vtanh.f32 %v259_v42 }
 0x1ca   :  { %v263_v45 = vpop.f32.mrb[6].mxu1 }
 0x1cb   :  { %v264_v46 = vadd.f32 %v263_v45, %v171_v44  ;;  %v543_v47 = vpop.f32.mrb[7].mxu1 }
 0x1cd   :  { %596 = vtanh.f32 %v264_v46 }
 0x1cf   :  { %v593_v48 = vpop.eup %592 }
 0x1d3   :  { %v595_v49 = vpop.eup %594 }
 0x1d4   :  { %v572_v50 = vpack.c.bf16 %v595_v49, %v593_v48 }
 0x1d6   :  { %573 = vmatpush3.bf16.msra.mxu0 %v572_v50 }
 0x1d7   :  { %548 = vmatprep.subr.mxu0 %v628_v2  ;;  %v597_v52 = vpop.eup %596 }
 0x1da   :  { %549 = vmatpush3.msk.msra.mxu0 %vm183_vm3, %v597_v52 }
 0x1db   :  { %551 = vmatmul.mubr.msk.f32.vlgmr.msra.gmra.mrb[4].mxu0 %vm173_vm4, %v270_v51 }
 0x1dc   :  { %553 = vmatprep.mubr.msk.f32.mxu0 %vm629_vm1, %v628_v2 }
 0x1df   :  { %554 = vmatmul.mubr.msk.f32.gmra.mrb[6].mxu0 %vm173_vm4, %v271_v53 }
 0x1e0   :  { %556 = vmatprep.mubr.msk.f32.mxu0 %vm629_vm1, %v628_v2 }
 0x1e3   :  { %557 = vmatmul.mubr.msk.f32.gmra.mrb[8].mxu0 %vm173_vm4, %v272_v54 }
 0x2ae   :  { %v369_v55 = vpop.f32.mrb[4].mxu0 }
 0x2af   :  { %v552_v57 = vpop.f32.mrb[5].mxu0  ;;  %v370_v58 = vadd.f32 %v369_v55, %v279_v56 }
 0x2b1   :  { %598 = vtanh.f32 %v370_v58 }
 0x2b2   :  { %v374_v60 = vpop.f32.mrb[6].mxu0 }
 0x2b3   :  { %v375_v61 = vadd.f32 %v374_v60, %v284_v59  ;;  %v555_v62 = vpop.f32.mrb[7].mxu0 }
 0x2b5   :  { %600 = vtanh.f32 %v375_v61 }
 0x2b6   :  { %v379_v0 = vpop.f32.mrb[8].mxu0 }
 0x2b7   :  { %v380_v1 = vadd.f32 %v379_v0, %v289_v63  ;;  %v558_v3 = vpop.f32.mrb[9].mxu0 }
 0x2b9   :  { %602 = vtanh.f32 %v380_v1 }
 0x2bb   :  { %v599_v4 = vpop.eup %598 }
 0x2bf   :  { %v601_v5 = vpop.eup %600 }
 0x2c0   :  { %v575_v6 = vpack.c.bf16 %v601_v5, %v599_v4 }
 0x2c2   :  { %576 = vmatpush3.bf16.msra.mxu1 %v575_v6 }
 0x2c3   :  { %563 = vmatprep.subr.mxu1 %v628_v2  ;;  %v603_v8 = vpop.eup %602 }
 0x2c6   :  { %564 = vmatpush3.msk.msra.mxu1 %vm183_vm3, %v603_v8 }
 0x2c7   :  { %566 = vmatmul.mubr.msk.f32.vlgmr.msra.gmra.mrb[8].mxu1 %vm173_vm4, %v386_v7 }
 0x39a   :  { %v465_v10 = vpop.f32.mrb[8].mxu1 }
 0x39b   :  { %v466_v11 = vadd.f32 %v465_v10, %v391_v9  ;;  %v567_v12 = vpop.f32.mrb[9].mxu1 }
 0x39d   :  { %469 = vst [vmem:[#allocation2] sm:$0xff] %v466_v11 }
 0x39e   :  { %615 = shalt.err (!%p612_p4)
}
 0x39f   :  { %s616_s24 = scalar_lea.hbm %s805_s9, 128 }
 0x3a0   :  { %p617_p5 = scmp.ne.s32.totalorder %s805_s9, %s616_s24  ;;  %p620_p6 = scmp.lt.u32.totalorder %s616_s24, %s805_s9 }
 0x3a2   :  { %p622_p7 = pnand %p620_p6, %p617_p5 }
 0x3a4   :  { %625 = shalt.err (!%p622_p7)
}
 0x3a5   :  { %479 = dma.vmem_to_hbm [thread:$0]  %s477_s1, 128, %s805_s9, [#allocation3]  }
 0x3a6   :  { %626 = dma.done.wait [#allocation3], 128  }
 0x3a7   :  { %627 = vsyncadd [#allocation3], 4294967168 }
 0x3a8   :  { %483 = vsyncpa [#allocation3], 1 }

</bundles_post_ra>
